<compile_context>
chip_gen: v7x
topology: tpu7x:2x2x1
jax: 0.10.0
libtpu: 0.0.40
codegen_flags: <defaults>
</compile_context>

<pallas_src>
import jax
import jax.numpy as jnp
from jax.experimental import pallas as pl
from jax.experimental.pallas import tpu as pltpu

_LANE = 128
_SUBLANE_ROUND = 32   # covers sublane packing for 32-bit (8), 16-bit (16), 8-bit (32)


def _cdiv(a: int, b: int) -> int:
    return -(-a // b)


def _scale_kernel(param_ref, x_ref, o_ref):
    # param_ref: scalar-prefetch SMEM (1,) f32; x_ref / o_ref: (tile_rows, 128) VMEM tiles.
    o_ref[...] = (x_ref[...] * param_ref[0]).astype(o_ref.dtype)


def _hw_config():
    """Return (block_bytes, vmem_limit_bytes_or_None, two_cores) per TPU generation."""
    try:
        info = pltpu.get_tpu_info()
        vmem_cap = int(getattr(info, "vmem_capacity_bytes", 128 << 20))
    except Exception:
        vmem_cap = None
    if vmem_cap is not None and vmem_cap <= (64 << 20):
        # v7x-class: 64 MiB physical VMEM (32 MiB scoped default), 2 TensorCores.
        # 4 MiB blocks sized by the wider dtype -> <=16 MiB double-buffered residency.
        return (4 << 20), None, True
    if vmem_cap is not None:
        # v5e / v6e: 128 MiB VMEM. 8 MiB blocks (<=32 MiB resident); raise the
        # scoped limit (v5e default is only 16 MiB).
        return (8 << 20), (64 << 20), False
    # Unknown part: 2 MiB blocks fit even a 16 MiB scoped default; leave limit alone.
    return (2 << 20), None, False


def single_param_forward(
    x: jax.Array,
    param: jax.Array,
    *,
    min_pallas_bytes: int = 1 << 20,
    donate_x: bool = False,
) -> jax.Array:
    """y = x * param, where param has shape (1,) float32 (like nn.Parameter)."""
    param_f32 = param if param.dtype == jnp.float32 else param.astype(jnp.float32)
    out_dtype = jnp.result_type(x.dtype, jnp.float32)  # torch promotion: x * f32 param

    n = x.size
    supported = x.dtype in (jnp.float32, jnp.bfloat16, jnp.float16)  # excludes f64/ints
    max_itemsize = max(jnp.dtype(x.dtype).itemsize, jnp.dtype(out_dtype).itemsize)
    tiny = (n * max_itemsize) < min_pallas_bytes

    if n == 0 or (not supported) or (n % _LANE != 0) or tiny:
        # Bypass: tiny tensors (launch overhead dominates), ragged sizes,
        # integer / f64 inputs.  XLA's fused elementwise is at roofline here.
        # TODO(synk): handle ragged (non-multiple-of-128) inputs in-kernel.
        return (x * param_f32[0]).astype(out_dtype)

    # Free reshape (no pad, no extra HBM pass): lane-dense (rows, 128) slab.
    rows = n // _LANE
    x2d = x.reshape(rows, _LANE)

    block_bytes, vmem_limit, two_cores = _hw_config()

    # Size the block by the wider of input/output element sizes so the f32
    # output tile never blows VMEM residency for narrow-float inputs.
    tile_rows = max(_SUBLANE_ROUND, block_bytes // (_LANE * max_itemsize))
    tile_rows = (tile_rows // _SUBLANE_ROUND) * _SUBLANE_ROUND

    if rows <= tile_rows:
        tile_rows = rows          # single full block (block dim == full array dim)
        grid_len = 1
    else:
        grid_len = _cdiv(rows, tile_rows)
        if two_cores:
            # v7x: keep the "parallel" axis an even length so both TensorCores
            # get balanced work (otherwise one TC idles on 1/3/5... block grids).
            grid_len = ((grid_len + 1) // 2) * 2
            tile_rows = _cdiv(rows, grid_len)
            tile_rows = _cdiv(tile_rows, _SUBLANE_ROUND) * _SUBLANE_ROUND
            grid_len = _cdiv(rows, tile_rows)

    compiler_kwargs = dict(dimension_semantics=("parallel",))
    if vmem_limit is not None:
        compiler_kwargs["vmem_limit_bytes"] = vmem_limit

    call_kwargs = {}
    if donate_x and out_dtype == x.dtype:
        # Optional: reuse x's buffer for the output when the caller donates x
        # (x2d is operand index 1; param is the scalar-prefetch operand 0).
        call_kwargs["input_output_aliases"] = {1: 0}

    y2d = pl.pallas_call(
        _scale_kernel,
        out_shape=jax.ShapeDtypeStruct((rows, _LANE), out_dtype),
        grid_spec=pltpu.PrefetchScalarGridSpec(
            num_scalar_prefetch=1,                      # param -> SMEM once, before the grid
            grid=(grid_len,),
            in_specs=[pl.BlockSpec((tile_rows, _LANE), lambda i, p: (i, 0))],
            out_specs=pl.BlockSpec((tile_rows, _LANE), lambda i, p: (i, 0)),
        ),
        compiler_params=pltpu.CompilerParams(**compiler_kwargs),
        **call_kwargs,
    )(param_f32, x2d)

    return y2d.reshape(x.shape)


if __name__ == "__main__":
    key = jax.random.PRNGKey(0)

    # Deterministic parameter (module default is 0.0; use a nonzero value so
    # the multiply is observable).
    initial_value = 0.5
    param = jnp.array([initial_value], dtype=jnp.float32)  # shape (1,), like nn.Parameter

    # Small NCHW input consistent with typical use (2*4*16*16 = 2048 = 16*128).
    x = jax.random.normal(key, (2, 4, 16, 16), dtype=jnp.float32)
    y_ref = x * param[0]

    # 1) Default path: tiny tensor -> XLA bypass (launch overhead dominates there).
    y = jax.block_until_ready(single_param_forward(x, param))
    assert y.shape == x.shape and y.dtype == y_ref.dtype
    assert bool(jnp.array_equal(y, y_ref)), "bypass path mismatch vs reference"

    # 2) Force the Pallas kernel path on the same small input to exercise it.
    y_k = jax.block_until_ready(single_param_forward(x, param, min_pallas_bytes=0))
    assert y_k.shape == x.shape and y_k.dtype == y_ref.dtype
    assert bool(jnp.array_equal(y_k, y_ref)), "pallas path mismatch vs reference"

    print("KERNEL_OK")
</pallas_src>

<mosaic_0001>
module attributes {stable_mosaic.version = 11 : i64} {
  func.func @_scale_kernel(%arg0: i32, %arg1: memref<1xf32, #tpu.memory_space<smem>>, %arg2: memref<16x128xf32, #tpu.memory_space<vmem>>, %arg3: memref<16x128xf32, #tpu.memory_space<vmem>>) attributes {dimension_semantics = [#tpu.dimension_semantics<parallel>], iteration_bounds = array<i64: 1>, scalar_prefetch = 1 : i64, scratch_operands = 0 : i64, tpu.core_type = #tpu.core_type<tc>, window_params = [{transform_indices = @transform_0, window_bounds = array<i64: 16, 128>}, {transform_indices = @transform_1, window_bounds = array<i64: 16, 128>}]} {
    %c0 = arith.constant 0 : index
    %c0_0 = arith.constant 0 : index
    %0 = vector.load %arg2[%c0, %c0_0] : memref<16x128xf32, #tpu.memory_space<vmem>>, vector<16x128xf32>
    %c0_1 = arith.constant 0 : index
    %1 = memref.load %arg1[%c0_1] : memref<1xf32, #tpu.memory_space<smem>>
    %2 = vector.broadcast %1 : f32 to vector<16x128xf32>
    %3 = arith.mulf %0, %2 : vector<16x128xf32>
    %c0_2 = arith.constant 0 : index
    %c0_3 = arith.constant 0 : index
    %4 = vector.load %arg3[%c0_2, %c0_3] : memref<16x128xf32, #tpu.memory_space<vmem>>, vector<16x128xf32>
    tpu.vector_store %arg3[%c0_2, %c0_3], %3 {strides = array<i32>} : memref<16x128xf32, #tpu.memory_space<vmem>>, vector<16x128xf32>,
    return
  }
  func.func @transform_0(%arg0: i32, %arg1: memref<1xf32, #tpu.memory_space<smem>>) -> (i32, i32) {
    %c0_i32 = arith.constant 0 : i32
    %c0_i32_0 = arith.constant 0 : i32
    return %arg0, %c0_i32 : i32, i32
  }
  func.func @transform_1(%arg0: i32, %arg1: memref<1xf32, #tpu.memory_space<smem>>) -> (i32, i32) {
    %c0_i32 = arith.constant 0 : i32
    %c0_i32_0 = arith.constant 0 : i32
    return %arg0, %c0_i32 : i32, i32
  }
}

</mosaic_0001>

<bundles_post_ra>
// kernel: tpu_custom_call.1
= control target key start
LH: loop header
LB: loop body
LE: loop exit
PB: predicated region body
PF: predicated region fallthrough
CT: control target
= control target key end

     0   :  { %8 = vsyncpa [#allocation5], 0  ;;  %s154_s0 = inlined_call_operand.<no memory space> [shape: f32[1], index: 0, kind: input, shape index: {}]   ;;  %s155_s1 = inlined_call_operand.hbm [shape: f32[16,128], index: 1, kind: input, shape index: {}]   ;;  %s156_s2 = inlined_call_operand.hbm [shape: f32[16,128], index: 2, kind: output, shape index: {}]  }
   0x1   :  { %9 = vsyncpa [#allocation6], 0  ;;  %s102_s9 = smov [#allocation4]   ;;  %s54_s13 = scalar_lea.hbm %s155_s1, 256 }
   0x2   :  { %s15_s10 = sshll.u32 %s102_s9, 4  ;;  %p55_p0 = scmp.ne.s32.totalorder %s155_s1, %s54_s13  ;;  %s16_s10 = int_to_ptr.vmem [resolvable:$true] %s15_s10 }
   0x3   :  { %p58_p1 = scmp.lt.u32.totalorder %s54_s13, %s155_s1 }
   0x5   :  { %p60_p2 = pnand %p58_p1, %p55_p0 }
   0x7   :  { %63 = shalt.err (!%p60_p2)
}
   0x8   :  { %s64_s18 = scalar_lea.vmem %s16_s10, 256  ;;  %p69_p4 = scmp.lt.s32.totalorder %s16_s10, %s16_s10 }
   0x9   :  { %p65_p3 = scmp.ne.s32.totalorder %s16_s10, %s64_s18  ;;  %p70_p5 = scmp.lt.s32.totalorder %s64_s18, %s64_s18 }
   0xb   :  { %p71_p6 = por %p70_p5, %p69_p4 }
   0xd   :  { %p72_p7 = pnand %p71_p6, %p65_p3 }
   0xf   :  { %75 = shalt.err (!%p72_p7)
}
  0x10   :  { %s103_s19 = smov 128   ;;  %s104_s20 = smov 8  }
  0x11   :  { %21 = dma.hbm_to_vmem [thread:$0]  %s155_s1, 256, %s16_s10, [#allocation5], %s103_s19, %s103_s19, %s104_s20  }
  0x12   :  { %98 = dma.done.wait [#allocation5], 256  }
  0x13   :  { %99 = vsyncadd [#allocation5], 4294967040  ;;  %v28_v0 = vstv %s154_s0  ;;  %s105_s25 = smov [#allocation7]   ;;  %v25_v1 = vld [vmem:[#allocation4] sm:$0xff]  ;;  %v26_v2 = vld [vmem:[#allocation4 + $0x8] sm:$0xff] }
  0x14   :  { %s38_s26 = sshll.u32 %s105_s25, 4  ;;  %v29_v3 = vmul.f32 %v28_v0, %v25_v1  ;;  %v30_v4 = vmul.f32 %v28_v0, %v26_v2  ;;  %s39_s26 = int_to_ptr.vmem [resolvable:$true] %s38_s26 }
  0x15   :  { %s76_s27 = scalar_lea.vmem %s39_s26, 256  ;;  %p81_p9 = scmp.lt.s32.totalorder %s39_s26, %s39_s26 }
  0x16   :  { %31 = vst [vmem:[#allocation7] sm:$0xff] %v29_v3  ;;  %32 = vst [vmem:[#allocation7 + $0x8] sm:$0xff] %v30_v4  ;;  %p77_p8 = scmp.ne.s32.totalorder %s39_s26, %s76_s27  ;;  %p82_p10 = scmp.lt.s32.totalorder %s76_s27, %s76_s27 }
  0x18   :  { %p83_p11 = por %p82_p10, %p81_p9 }
  0x1a   :  { %p84_p12 = pnand %p83_p11, %p77_p8 }
  0x1c   :  { %87 = shalt.err (!%p84_p12)
}
  0x1d   :  { %s88_s0 = scalar_lea.hbm %s156_s2, 256 }
  0x1e   :  { %p89_p13 = scmp.ne.s32.totalorder %s156_s2, %s88_s0  ;;  %p92_p0 = scmp.lt.u32.totalorder %s88_s0, %s156_s2 }
  0x20   :  { %p94_p1 = pnand %p92_p0, %p89_p13 }
  0x22   :  { %97 = shalt.err (!%p94_p1)
}
  0x23   :  { %44 = dma.vmem_to_hbm [thread:$0]  %s39_s26, 256, %s156_s2, [#allocation6], %s103_s19, %s103_s19, %s104_s20  }
  0x24   :  { %100 = dma.done.wait [#allocation6], 256  }
  0x25   :  { %101 = vsyncadd [#allocation6], 4294967040 }
  0x26   :  { %48 = vsyncpa [#allocation5], 1 }
  0x27   :  { %49 = vsyncpa [#allocation6], 1 }

</bundles_post_ra>
